<compile_context>
chip_gen: v7x
topology: tpu7x:2x2x1
jax: 0.10.0
libtpu: 0.0.40
codegen_flags: <defaults>
</compile_context>

<pallas_src>
import numpy as np
import jax
import jax.numpy as jnp
from jax.experimental import pallas as pl
from jax.experimental.pallas import tpu as pltpu

# ----------------------------- configuration ------------------------------
N, CIN, H, W = 2, 3, 16, 16          # img: (N, 3, 16, 16) NCHW, mask: (N, 16, 16)
PATCH = 4                            # total backbone stride
HF, WF = H // PATCH, W // PATCH      # feature map 4 x 4
M = N * HF * WF                      # 32 flattened feature positions (h, w, n)
KIN = CIN * PATCH * PATCH            # 48 (im2col contraction dim)
CBACK = 64                           # backbone output channels
HIDDEN = 32                          # bottleneck / transformer hidden dim
NPF = HIDDEN // 2                    # num_pos_feats of the sine embedding
TEMPERATURE = 10000.0
SCALE = 2.0 * np.pi
EPS = 1e-6

# DETR PositionEmbeddingSine frequencies + the sin/cos phase offsets.
_DIM_T = TEMPERATURE ** (2.0 * (np.arange(NPF) // 2) / NPF)
INV_FREQ = (1.0 / _DIM_T).astype(np.float32).reshape(1, NPF)
PHASE = ((np.arange(NPF) % 2) * (np.pi / 2.0)).astype(np.float32).reshape(1, NPF)

# consts operand layout (single (1, 128) f32 row): [ b1 | b2 | inv_freq | phase ]
O_B1 = 0
O_B2 = CBACK
O_INV = CBACK + HIDDEN
O_PH = CBACK + HIDDEN + NPF
C_LANES = CBACK + HIDDEN + 2 * NPF
assert C_LANES == 128


# ------------------------------ Pallas kernel -------------------------------
def _fused_kernel(pyx_ref, w1_ref, w2_ref, c_ref, out_ref):
    pyx = pyx_ref[...]                                   # (M, KIN+2) f32
    patches = pyx[:, :KIN].astype(jnp.bfloat16)          # MXU operand
    y = pyx[:, KIN:KIN + 1]                              # (M, 1) normalized y
    x = pyx[:, KIN + 1:KIN + 2]                          # (M, 1) normalized x

    c = c_ref[...]                                       # (1, 128) packed consts
    b1 = c[:, O_B1:O_B1 + CBACK]                         # (1, 64)
    b2 = c[:, O_B2:O_B2 + HIDDEN]                        # (1, 32)
    inv = c[:, O_INV:O_INV + NPF]                        # (1, 16)
    phase = c[:, O_PH:O_PH + NPF]                        # (1, 16)

    # backbone conv (im2col matmul) + bias + ReLU, then 1x1 bottleneck conv.
    # bf16 MXU operands, f32 accumulation; epilogue stays f32 (v5e-safe).
    h = jnp.dot(patches, w1_ref[...], preferred_element_type=jnp.float32)
    h = jnp.maximum(h + b1, 0.0)
    feat = jnp.dot(h.astype(jnp.bfloat16), w2_ref[...],
                   preferred_element_type=jnp.float32) + b2   # (M, HIDDEN)

    # sine position embedding: even channels sin, odd channels cos, via
    # cos(a) = sin(a + pi/2).  Two sin calls total, no iota/select/extra concat.
    pos_y = jnp.sin(y * inv + phase)                     # (M, NPF)
    pos_x = jnp.sin(x * inv + phase)                     # (M, NPF)

    # single lane-dense (M, 64) store: [ feat | pos_y | pos_x ]
    out_ref[...] = jnp.concatenate([feat, pos_y, pos_x], axis=1)


_VMEM_SPEC = pl.BlockSpec(memory_space=pltpu.MemorySpace.VMEM)

_fused_call = pl.pallas_call(
    _fused_kernel,
    out_shape=jax.ShapeDtypeStruct((M, 2 * HIDDEN), jnp.float32),
    in_specs=[_VMEM_SPEC] * 4,
    out_specs=_VMEM_SPEC,
)


# ------------------------------ forward (wrapper) ---------------------------
def backbone_bottleneck_pe_forward(img, mask, params):
    # im2col patches with rows ordered (h*Wf + w)*N + n so that the kernel
    # output reshapes directly to the module's (HW, N, C) layout (no transpose
    # after the kernel).
    x = img.reshape(N, CIN, HF, PATCH, WF, PATCH)
    patches = x.transpose(2, 4, 0, 1, 3, 5).reshape(M, KIN)

    # mask: F.interpolate(mode='nearest') with integer factor == strided slice
    mask_feat = mask[:, ::PATCH, ::PATCH]                       # (N, HF, WF) bool

    # sine position embedding: cumsum + normalize in (tiny) JAX glue,
    # frequency multiply + sin in the fused Pallas kernel.
    not_mask = (~mask_feat).astype(jnp.float32)
    y_embed = jnp.cumsum(not_mask, axis=1)
    x_embed = jnp.cumsum(not_mask, axis=2)
    y_embed = y_embed / (y_embed[:, -1:, :] + EPS) * SCALE
    x_embed = x_embed / (x_embed[:, :, -1:] + EPS) * SCALE
    yx = jnp.stack([y_embed.transpose(1, 2, 0).reshape(M),      # same (h, w, n)
                    x_embed.transpose(1, 2, 0).reshape(M)],     # row order
                   axis=1)                                      # (M, 2)

    # single packed input operand: [patches | y | x]  (one DMA instead of two)
    pyx = jnp.concatenate([patches, yx], axis=1)                # (M, KIN+2) f32

    out = _fused_call(pyx, params["w1"], params["w2"], params["consts"])

    feat_flat = out[:, :HIDDEN]
    pos_flat = out[:, HIDDEN:]
    # free reshapes (row order already matches (HW, N, C)); no transposes.
    feat_vec = feat_flat.reshape(HF * WF, N, HIDDEN)
    pos_embed_vec = pos_flat.reshape(HF * WF, N, HIDDEN)
    mask_vec = mask_feat.reshape(N, HF * WF)                    # (N, HW)
    return feat_vec, mask_vec, pos_embed_vec


# ------------------------------ params & reference --------------------------
def init_params(key):
    k1, k2, k3, k4 = jax.random.split(key, 4)
    # weights stored in bf16 (MXU-native); biases stay f32.
    w1 = (jax.random.normal(k1, (KIN, CBACK), jnp.float32) * 0.1).astype(jnp.bfloat16)
    b1 = jax.random.normal(k2, (1, CBACK), jnp.float32) * 0.1
    w2 = (jax.random.normal(k3, (CBACK, HIDDEN), jnp.float32) * 0.1).astype(jnp.bfloat16)
    b2 = jax.random.normal(k4, (1, HIDDEN), jnp.float32) * 0.1
    # packed (1, 128) consts operand: [ b1 | b2 | inv_freq | phase ]
    consts = jnp.concatenate(
        [b1, b2, jnp.asarray(INV_FREQ), jnp.asarray(PHASE)], axis=1)
    return dict(w1=w1, b1=b1, w2=w2, b2=b2, consts=consts)


def reference_forward(img, mask, params):
    # pure-JAX reference in the original (n, h, w) ordering + final transposes;
    # same bf16 operand rounding so the comparison is apples-to-apples.
    x = img.reshape(N, CIN, HF, PATCH, WF, PATCH)
    patches = x.transpose(0, 2, 4, 1, 3, 5).reshape(M, KIN)
    h = jnp.maximum(
        jnp.dot(patches.astype(jnp.bfloat16), params["w1"],
                preferred_element_type=jnp.float32) + params["b1"], 0.0)
    feat_flat = jnp.dot(h.astype(jnp.bfloat16), params["w2"],
                        preferred_element_type=jnp.float32) + params["b2"]
    mask_feat = mask[:, ::PATCH, ::PATCH]
    not_mask = (~mask_feat).astype(jnp.float32)
    y_embed = jnp.cumsum(not_mask, axis=1)
    x_embed = jnp.cumsum(not_mask, axis=2)
    y_embed = y_embed / (y_embed[:, -1:, :] + EPS) * SCALE
    x_embed = x_embed / (x_embed[:, :, -1:] + EPS) * SCALE
    inv = jnp.asarray(INV_FREQ)[0]
    y_ang = y_embed.reshape(M, 1) * inv[None, :]
    x_ang = x_embed.reshape(M, 1) * inv[None, :]
    even = (jnp.arange(NPF) % 2) == 0
    pos_y = jnp.where(even[None, :], jnp.sin(y_ang), jnp.cos(y_ang))
    pos_x = jnp.where(even[None, :], jnp.sin(x_ang), jnp.cos(x_ang))
    pos_flat = jnp.concatenate([pos_y, pos_x], axis=1)
    feat_vec = feat_flat.reshape(N, HF * WF, HIDDEN).transpose(1, 0, 2)
    pos_vec = pos_flat.reshape(N, HF * WF, HIDDEN).transpose(1, 0, 2)
    mask_vec = mask_feat.reshape(N, HF * WF)
    return feat_vec, mask_vec, pos_vec


# ----------------------------------- main -----------------------------------
if __name__ == "__main__":
    key = jax.random.PRNGKey(0)
    kp, ki = jax.random.split(key)
    params = init_params(kp)

    img = jax.random.normal(ki, (N, CIN, H, W), jnp.float32)
    # padding-style mask (True == padded), as produced by NestedTensor batching
    hh = jnp.arange(H)[None, :, None]
    ww = jnp.arange(W)[None, None, :]
    valid_h = jnp.array([16, 12])[:, None, None]
    valid_w = jnp.array([16, 10])[:, None, None]
    mask = (hh >= valid_h) | (ww >= valid_w)          # (N, H, W) bool

    fwd = jax.jit(backbone_bottleneck_pe_forward)
    feat_vec, mask_vec, pos_vec = jax.block_until_ready(fwd(img, mask, params))

    # correctness check against a pure-JAX reference
    r_feat, r_mask, r_pos = reference_forward(img, mask, params)
    assert feat_vec.shape == (HF * WF, N, HIDDEN)
    assert pos_vec.shape == (HF * WF, N, HIDDEN)
    assert mask_vec.shape == (N, HF * WF) and mask_vec.dtype == jnp.bool_
    np.testing.assert_allclose(np.asarray(feat_vec), np.asarray(r_feat),
                               rtol=2e-3, atol=2e-3)
    np.testing.assert_allclose(np.asarray(pos_vec), np.asarray(r_pos),
                               rtol=1e-3, atol=1e-3)
    assert bool(jnp.all(mask_vec == r_mask))

    print("KERNEL_OK")
</pallas_src>

<mosaic_0001>
module attributes {stable_mosaic.version = 11 : i64} {
  func.func @_fused_kernel(%arg0: memref<32x50xf32, #tpu.memory_space<vmem>>, %arg1: memref<48x64xbf16, #tpu.memory_space<vmem>>, %arg2: memref<64x32xbf16, #tpu.memory_space<vmem>>, %arg3: memref<1x128xf32, #tpu.memory_space<vmem>>, %arg4: memref<32x64xf32, #tpu.memory_space<vmem>>) attributes {dimension_semantics = [], scalar_prefetch = 0 : i64, scratch_operands = 0 : i64, tpu.core_type = #tpu.core_type<tc>} {
    %c0 = arith.constant 0 : index
    %c0_0 = arith.constant 0 : index
    %0 = vector.load %arg0[%c0, %c0_0] : memref<32x50xf32, #tpu.memory_space<vmem>>, vector<32x50xf32>
    %1 = vector.extract_strided_slice %0 {offsets = [0, 0], sizes = [32, 48], strides = [1, 1]} : vector<32x50xf32> to vector<32x48xf32>
    %2 = arith.truncf %1 : vector<32x48xf32> to vector<32x48xbf16>
    %3 = vector.extract_strided_slice %0 {offsets = [0, 48], sizes = [32, 1], strides = [1, 1]} : vector<32x50xf32> to vector<32x1xf32>
    %4 = vector.extract_strided_slice %0 {offsets = [0, 49], sizes = [32, 1], strides = [1, 1]} : vector<32x50xf32> to vector<32x1xf32>
    %c0_1 = arith.constant 0 : index
    %c0_2 = arith.constant 0 : index
    %5 = vector.load %arg3[%c0_1, %c0_2] : memref<1x128xf32, #tpu.memory_space<vmem>>, vector<1x128xf32>
    %6 = vector.extract_strided_slice %5 {offsets = [0, 0], sizes = [1, 64], strides = [1, 1]} : vector<1x128xf32> to vector<1x64xf32>
    %7 = vector.extract_strided_slice %5 {offsets = [0, 64], sizes = [1, 32], strides = [1, 1]} : vector<1x128xf32> to vector<1x32xf32>
    %8 = vector.extract_strided_slice %5 {offsets = [0, 96], sizes = [1, 16], strides = [1, 1]} : vector<1x128xf32> to vector<1x16xf32>
    %9 = vector.extract_strided_slice %5 {offsets = [0, 112], sizes = [1, 16], strides = [1, 1]} : vector<1x128xf32> to vector<1x16xf32>
    %c0_3 = arith.constant 0 : index
    %c0_4 = arith.constant 0 : index
    %10 = vector.load %arg1[%c0_3, %c0_4] : memref<48x64xbf16, #tpu.memory_space<vmem>>, vector<48x64xbf16>
    %cst = arith.constant dense<0.000000e+00> : vector<32x64xf32>
    %11 = tpu.matmul %2, %10, %cst {dimension_numbers = #tpu.dot_dimension_numbers<[1], [0], [0], [1], [0, 0, 1, 1], [], []>} : vector<32x48xbf16>, vector<48x64xbf16>, vector<32x64xf32> -> vector<32x64xf32>
    %12 = vector.broadcast %6 : vector<1x64xf32> to vector<32x64xf32>
    %13 = arith.addf %11, %12 : vector<32x64xf32>
    %cst_5 = arith.constant 0.000000e+00 : f32
    %14 = vector.broadcast %cst_5 : f32 to vector<32x64xf32>
    %15 = arith.maximumf %13, %14 : vector<32x64xf32>
    %16 = arith.truncf %15 : vector<32x64xf32> to vector<32x64xbf16>
    %c0_6 = arith.constant 0 : index
    %c0_7 = arith.constant 0 : index
    %17 = vector.load %arg2[%c0_6, %c0_7] : memref<64x32xbf16, #tpu.memory_space<vmem>>, vector<64x32xbf16>
    %cst_8 = arith.constant dense<0.000000e+00> : vector<32x32xf32>
    %18 = tpu.matmul %16, %17, %cst_8 {dimension_numbers = #tpu.dot_dimension_numbers<[1], [0], [0], [1], [0, 0, 1, 1], [], []>} : vector<32x64xbf16>, vector<64x32xbf16>, vector<32x32xf32> -> vector<32x32xf32>
    %19 = vector.broadcast %7 : vector<1x32xf32> to vector<32x32xf32>
    %20 = arith.addf %18, %19 : vector<32x32xf32>
    %21 = vector.broadcast %3 : vector<32x1xf32> to vector<32x16xf32>
    %22 = vector.broadcast %8 : vector<1x16xf32> to vector<32x16xf32>
    %23 = arith.mulf %21, %22 : vector<32x16xf32>
    %24 = vector.broadcast %9 : vector<1x16xf32> to vector<32x16xf32>
    %25 = arith.addf %23, %24 : vector<32x16xf32>
    %26 = math.sin %25 : vector<32x16xf32>
    %27 = vector.broadcast %4 : vector<32x1xf32> to vector<32x16xf32>
    %28 = vector.broadcast %8 : vector<1x16xf32> to vector<32x16xf32>
    %29 = arith.mulf %27, %28 : vector<32x16xf32>
    %30 = vector.broadcast %9 : vector<1x16xf32> to vector<32x16xf32>
    %31 = arith.addf %29, %30 : vector<32x16xf32>
    %32 = math.sin %31 : vector<32x16xf32>
    %33 = tpu.concatenate %20, %26, %32 in 1 : vector<32x32xf32>, vector<32x16xf32>, vector<32x16xf32> -> vector<32x64xf32>
    %c0_9 = arith.constant 0 : index
    %c0_10 = arith.constant 0 : index
    %34 = vector.load %arg4[%c0_9, %c0_10] : memref<32x64xf32, #tpu.memory_space<vmem>>, vector<32x64xf32>
    tpu.vector_store %arg4[%c0_9, %c0_10], %33 {strides = array<i32>} : memref<32x64xf32, #tpu.memory_space<vmem>>, vector<32x64xf32>,
    return
  }
}

</mosaic_0001>

<bundles_post_ra>
// kernel: backbone_bottleneck_pe_forward.1
= control target key start
LH: loop header
LB: loop body
LE: loop exit
PB: predicated region body
PF: predicated region fallthrough
CT: control target
= control target key end

     0   :  { %v1307_v0 = vmov 48   ;;  %vm55_vm0 = vcmask 392192   ;;  %v1308_v10 = vmov 49   ;;  %s1309_s29 = smov 112   ;;  %s1310_s8 = smov 64   ;;  %s2183_s1 = inlined_call_operand.vmem [shape: bf16[48,64], index: 1, kind: input, shape index: {}]   ;;  %s2184_s0 = inlined_call_operand.vmem [shape: f32[32,50], index: 0, kind: input, shape index: {}]   ;;  %s2185_s3 = inlined_call_operand.vmem [shape: f32[1,128], index: 3, kind: input, shape index: {}]   ;;  %s2186_s2 = inlined_call_operand.vmem [shape: bf16[64,32], index: 2, kind: input, shape index: {}]   ;;  %s2187_s4 = inlined_call_operand.vmem [shape: f32[32,64], index: 4, kind: output, shape index: {}]  }
   0x1   :  { %1265 = vset.pattern.permute.xlu1 %v1307_v0  ;;  %v1268_v1 = vld [vmem:[%s2183_s1] sm:$0xff]   ;;  %1264 = vset.pattern.permute.xlu0 %v1307_v0  ;;  %v20_v2 = vld [vmem:[%s2184_s0 + $0x10] sm:$0xff]  ;;  %v1269_v3 = vld [vmem:[%s2183_s1 + $0x8] sm:$0xff]   ;;  %v1311_v62 = vmov 683565275  }
   0x2   :  { %1199 = vmatprep.subr.bf16.mxu0 %v1268_v1  ;;  %220 = vperm.xlu1 %1265, %v20_v2   ;;  %v21_v4 = vld [vmem:[%s2184_s0 + $0x18] sm:$0xff]  ;;  %v19_v5 = vld [vmem:[%s2184_s0 + $0x8] sm:$0xff]  ;;  %v1270_v6 = vld [vmem:[%s2183_s1 + $0x10] sm:$0xff]   ;;  %v1312_v0 = vmov 2475754826  }
   0x3   :  { %1200 = vmatpush3.bf16.msra.mxu0 %v1268_v1  ;;  %v18_v7 = vld [vmem:[%s2184_s0] sm:$0xff]  ;;  %v23_v9 = vpack.c.bf16 %v21_v4, %v20_v2  ;;  %v1272_v13 = vld [vmem:[%s2186_s2 + $0x8] sm:$0xff]   ;;  %v1273_v14 = vld [vmem:[%s2186_s2 + $0x10] sm:$0xff]  }
   0x4   :  { %1201 = vmatprep.subr.bf16.mxu0 %v1269_v3  ;;  %v22_v8 = vpack.c.bf16 %v19_v5, %v18_v7  ;;  %210 = vperm.xlu0 %1264, %v18_v7   ;;  %v1369_v11 = vld [vmem:[%s2185_s3] ss:$0 sm:$0xff]  ;;  %v1274_v15 = vld [vmem:[%s2186_s2 + $0x18] sm:$0xff]  }
   0x5   :  { %v1271_v12 = vld [vmem:[%s2186_s2] sm:$0xff]   ;;  %s1317_s2 = smov 80  }
   0x6   :  { %225 = vperm.xlu1 %1265, %v21_v4   ;;  %1205 = vmatprep.mubr.msk.bf16.mxu0 %vm55_vm0, %v22_v8 }
   0x7   :  { %1202 = vmatpush3.bf16.msra.mxu0 %v1269_v3  ;;  %1209 = vmatprep.subr.bf16.mxu1 %v1271_v12 }
   0x8   :  { %1203 = vmatprep.subr.bf16.mxu0 %v1270_v6  ;;  %215 = vperm.xlu0 %1264, %v19_v5  }
   0x9   :  { %1210 = vmatpush3.bf16.msra.mxu1 %v1271_v12  ;;  %v1314_v12 = vmov 2102212464  }
   0xa   :  { %1267 = vset.pattern.permute.xlu1 %v1308_v10  ;;  %1211 = vmatprep.subr.bf16.mxu1 %v1272_v13 }
   0xb   :  { %1204 = vmatpush3.bf16.msra.mxu0 %v1270_v6  ;;  %660 = vperm.xlu1 %1267, %v19_v5  }
   0xc   :  { %1266 = vset.pattern.permute.xlu0 %v1308_v10 }
   0xd   :  { %656 = vperm.xlu0 %1266, %v18_v7   ;;  %1212 = vmatpush3.bf16.msra.mxu1 %v1272_v13 }
   0xe   :  { %1206 = vmatmul.mubr.msk.bf16.vlgmr.msra.gmra.mrb[0].mxu0 %vm55_vm0, %v23_v9  ;;  %1213 = vmatprep.subr.bf16.mxu1 %v1273_v14 }
   0xf   :  { %664 = vperm.xlu1 %1267, %v20_v2   ;;  %v1313_v2 = vmov 2131351028  }
  0x11   :  { %668 = vperm.xlu0 %1266, %v21_v4   ;;  %1214 = vmatpush3.bf16.msra.mxu1 %v1273_v14 }
  0x12   :  { %1215 = vmatprep.subr.bf16.mxu1 %v1274_v15 }
  0x13   :  { %232 = vrot.lane.b32.xlu1 %v1369_v11, %s1309_s29 }
  0x15   :  { %149 = vrot.lane.b32.xlu0 %v1369_v11, %s1310_s8  ;;  %1216 = vmatpush3.bf16.msra.mxu1 %v1274_v15 }
  0x81   :  { %v221_v16 = vpop.permute.xlu1 %220 }
  0x82   :  { %v230_v44 = vmul.f32 %v1369_v11, %v221_v16 }
  0x83   :  { %v211_v17 = vpop.permute.xlu0 %210 }
  0x84   :  { %v228_v23 = vmul.f32 %v1369_v11, %v211_v17 }
  0x85   :  { %v226_v18 = vpop.permute.xlu1 %225 }
  0x86   :  { %v231_v45 = vmul.f32 %v1369_v11, %v226_v18 }
  0x87   :  { %v216_v19 = vpop.permute.xlu0 %215 }
  0x88   :  { %v229_v25 = vmul.f32 %v1369_v11, %v216_v19 }
  0x8a   :  { %v661_v20 = vpop.permute.xlu1 %660 }
  0x8b   :  { %v672_v53 = vmul.f32 %v1369_v11, %v661_v20 }
  0x8c   :  { %v657_v21 = vpop.permute.xlu0 %656 }
  0x8d   :  { %v671_v24 = vmul.f32 %v1369_v11, %v657_v21  ;;  %v1315_v21 = vmov 920167782  }
  0x8e   :  { %v665_v22 = vpop.permute.xlu1 %664 }
  0x8f   :  { %v1418_v54 = vmul.f32 %v1369_v11, %v665_v22 }
  0x90   :  { %v669_v26 = vpop.permute.xlu0 %668 }
  0x91   :  { %v674_v29 = vmul.f32 %v1369_v11, %v669_v26 }
  0x92   :  { %v1389_v27 = vpop.permute.xlu1 %232 }
  0x93   :  { %v1392_v28 = vadd.f32 %v671_v24, %v1389_v27  ;;  %v1396_v30 = vadd.f32 %v1389_v27, %v228_v23  ;;  %v1399_v31 = vadd.f32 %v1389_v27, %v229_v25  ;;  %v1404_v34 = vadd.f32 %v674_v29, %v1389_v27 }
  0x94   :  { %v1421_v56 = vadd.f32 %v1389_v27, %v230_v44  ;;  %v1424_v57 = vadd.f32 %v1389_v27, %v231_v45  ;;  %v1432_v8 = vadd.f32 %v672_v53, %v1389_v27  ;;  %v1316_v24 = vmov 1326507024  }
  0x95   :  { %v242_v32 = vand.u32 2139095040, %v1396_v30  ;;  %v682_v33 = vand.u32 2139095040, %v1392_v28  ;;  %v346_v36 = vand.u32 2139095040, %v1399_v31  ;;  %v239_v38 = vand.u32 2147483647, %v1396_v30 }
  0x96   :  { %v994_v40 = vand.u32 2139095040, %v1404_v34  ;;  %v343_v42 = vand.u32 2147483647, %v1399_v31  ;;  %v447_v7 = vand.u32 2147483647, %v1421_v56  ;;  %v450_v29 = vand.u32 2139095040, %v1421_v56 }
  0x97   :  { %v243_v35 = vshrl.u32 %v242_v32, 23  ;;  %v683_v39 = vshrl.u32 %v682_v33, 23  ;;  %v347_v43 = vshrl.u32 %v346_v36, 23  ;;  %v246_v46 = vand.u32 8388607, %v239_v38 }
  0x98   :  { %v995_v49 = vshrl.u32 %v994_v40, 23  ;;  %v350_v50 = vand.u32 8388607, %v343_v42  ;;  %v451_v53 = vshrl.u32 %v450_v29, 23  ;;  %vm241_vm15 = vcmp.lt.s32.totalorder %v1396_v30, 0 }
  0x99   :  { %v1156_v37 = vadd.s32 4294967169, %v243_v35  ;;  %v1172_v48 = vadd.s32 4294967169, %v683_v39  ;;  %v1160_v52 = vadd.s32 4294967169, %v347_v43  ;;  %v247_v55 = vor.u32 8388608, %v246_v46 }
  0x9a   :  { %v1184_v59 = vadd.s32 4294967169, %v995_v49  ;;  %v351_v61 = vor.u32 8388608, %v350_v50 }
  0x9b   :  { %v249_v41 = vadd.s32 1, %v1156_v37  ;;  %v689_v58 = vadd.s32 1, %v1172_v48  ;;  %v353_v4 = vadd.s32 1, %v1160_v52  ;;  %v1437_v14 = vshll.u32 %v247_v55, 8 }
  0x9c   :  { %v1439_v15 = vadd.s32 1, %v1184_v59  ;;  %v1442_v17 = vshll.u32 %v351_v61, 8 }
  0x9d   :  { %vm250_vm1 = vcmp.gt.s32.totalorder %v249_v41, 0  ;;  %vm690_vm2 = vcmp.gt.s32.totalorder %v689_v58, 0  ;;  %vm354_vm3 = vcmp.gt.s32.totalorder %v353_v4, 0 }
  0x9e   :  { %v251_v47 = vsel %vm250_vm1, %v249_v41, 0  ;;  %v355_v40 = vsel %vm354_vm3, %v353_v4, 0  ;;  %v1450_v41 = vsel %vm690_vm2, %v689_v58, 0  ;;  %vm1002_vm13 = vcmp.gt.s32.totalorder %v1439_v15, 0 }
  0x9f   :  { %v253_v51 = vand.u32 31, %v251_v47  ;;  %v252_v5 = vshrl.u32 %v251_v47, 5  ;;  %v356_v48 = vshrl.u32 %v355_v40, 5  ;;  %v357_v49 = vand.u32 31, %v355_v40 }
  0xa0   :  { %vm1559_vm2 = vcmp.le.f32.partialorder %v239_v38, 0.7853982  ;;  %vm345_vm3 = vcmp.lt.s32.totalorder %v1399_v31, 0 }
  0xa1   :  { %v254_v60 = vsub.s32 32, %v253_v51  ;;  %v256_v63 = vshll.u32 %v1311_v62, %v253_v51  ;;  %v259_v1 = vshll.u32 %v1312_v0, %v253_v51  ;;  %v262_v3 = vshll.u32 %v1313_v2, %v253_v51 }
  0xa2   :  { %v265_v16 = vshll.u32 %v1314_v12, %v253_v51  ;;  %v268_v23 = vshll.u32 %v1315_v21, %v253_v51  ;;  %vm271_vm4 = vcmp.lt.s32.totalorder %v252_v5, 1  ;;  %vm272_vm5 = vcmp.lt.s32.totalorder %v252_v5, 2 }
  0xa3   :  { %v257_v6 = vshrl.u32 %v1312_v0, %v254_v60  ;;  %v255_v9 = vshrl.u32 %v1311_v62, %v254_v60  ;;  %v260_v10 = vshrl.u32 %v1313_v2, %v254_v60  ;;  %v263_v13 = vshrl.u32 %v1314_v12, %v254_v60 }
  0xa4   :  { %v266_v22 = vshrl.u32 %v1315_v21, %v254_v60  ;;  %v269_v25 = vshrl.u32 %v1316_v24, %v254_v60  ;;  %vm274_vm6 = vcmp.lt.s32.totalorder %v252_v5, 4  ;;  %vm273_vm7 = vcmp.lt.s32.totalorder %v252_v5, 3 }
  0xa5   :  { %v258_v18 = vor.u32 %v257_v6, %v256_v63  ;;  %v261_v19 = vor.u32 %v260_v10, %v259_v1  ;;  %v264_v20 = vor.u32 %v263_v13, %v262_v3  ;;  %v358_v61 = vsub.s32 32, %v357_v49 }
  0xa6   :  { %v267_v32 = vor.u32 %v266_v22, %v265_v16  ;;  %v270_v33 = vor.u32 %v269_v25, %v268_v23  ;;  %v360_v63 = vshll.u32 %v1311_v62, %v357_v49  ;;  %v363_v1 = vshll.u32 %v1312_v0, %v357_v49 }
  0xa7   :  { %v275_v26 = vsel %vm271_vm4, %v255_v9, %v258_v18  ;;  %v276_v35 = vsel %vm274_vm6, %v264_v20, 2102212464  ;;  %v279_v37 = vsel %vm271_vm4, %v258_v18, %v261_v19  ;;  %v283_v39 = vsel %vm271_vm4, %v261_v19, %v264_v20 }
  0xa8   :  { %v277_v36 = vsel %vm273_vm7, %v261_v19, %v276_v35  ;;  %v280_v44 = vsel %vm274_vm6, %v267_v32, 920167782  ;;  %v284_v45 = vsel %vm274_vm6, %v270_v33, 1326507024  ;;  %v366_v3 = vshll.u32 %v1313_v2, %v357_v49 }
  0xa9   :  { %v278_v43 = vsel %vm272_vm5, %v275_v26, %v277_v36  ;;  %v281_v46 = vsel %vm273_vm7, %v264_v20, %v280_v44  ;;  %v285_v47 = vsel %vm273_vm7, %v267_v32, %v284_v45  ;;  %v369_v4 = vshll.u32 %v1314_v12, %v357_v49 }
  0xaa   :  { %v282_v50 = vsel %vm272_vm5, %v279_v37, %v281_v46  ;;  %v286_v51 = vsel %vm272_vm5, %v283_v39, %v285_v47  ;;  %v294_v52 = vmul.u32 %v1437_v14, %v278_v43  ;;  %v372_v5 = vshll.u32 %v1315_v21, %v357_v49 }
  0xab   :  { %v1457_v55 = vmul.u32.u64.low %v1437_v14, %v286_v51  ;;  %v1458_v59 = vmul.u32.u64.high %v1437_v14, %v286_v51, %v1457_v55  ;;  %v1461_v58 = vmul.u32.u64.low %v1437_v14, %v282_v50  ;;  %v1462_v60 = vmul.u32.u64.high %v1437_v14, %v282_v50, %v1461_v58 }
  0xac   :  { %vm375_vm8 = vcmp.lt.s32.totalorder %v356_v48, 1  ;;  %vm376_vm9 = vcmp.lt.s32.totalorder %v356_v48, 2  ;;  %v359_v6 = vshrl.u32 %v1311_v62, %v358_v61  ;;  %v361_v9 = vshrl.u32 %v1312_v0, %v358_v61 }
  0xad   :  { %v364_v10 = vshrl.u32 %v1313_v2, %v358_v61  ;;  %v367_v13 = vshrl.u32 %v1314_v12, %v358_v61  ;;  %vm296_vm10 = vc.u32 %v1458_v59, %v1461_v58  ;;  %v297_v14 = vadd.s32 1, %v1462_v60 }
  0xae   :  { %v370_v16 = vshrl.u32 %v1315_v21, %v358_v61  ;;  %vm378_vm11 = vcmp.lt.s32.totalorder %v356_v48, 4  ;;  %v362_v18 = vor.u32 %v361_v9, %v360_v63  ;;  %v373_v22 = vshrl.u32 %v1316_v24, %v358_v61 }
  0xaf   :  { %v365_v19 = vor.u32 %v364_v10, %v363_v1  ;;  %v368_v20 = vor.u32 %v367_v13, %v366_v3  ;;  %v298_v23 = vsel %vm296_vm10, %v297_v14, %v1462_v60  ;;  %vm377_vm12 = vcmp.lt.s32.totalorder %v356_v48, 3 }
  0xb0   :  { %v371_v25 = vor.u32 %v370_v16, %v369_v4  ;;  %v1164_v26 = vadd.s32 4294967169, %v451_v53  ;;  %v299_v29 = vadd.s32 %v298_v23, %v294_v52  ;;  %v374_v32 = vor.u32 %v373_v22, %v372_v5 }
  0xb1   :  { %v379_v33 = vsel %vm375_vm8, %v359_v6, %v362_v18  ;;  %v380_v35 = vsel %vm378_vm11, %v368_v20, 2102212464  ;;  %v383_v37 = vsel %vm375_vm8, %v362_v18, %v365_v19  ;;  %v387_v40 = vsel %vm375_vm8, %v365_v19, %v368_v20 }
  0xb2   :  { %v381_v36 = vsel %vm377_vm12, %v365_v19, %v380_v35  ;;  %v384_v39 = vsel %vm378_vm11, %v371_v25, 920167782  ;;  %v1487_v43 = vand.u32 31, %v1450_v41  ;;  %v300_v44 = vadd.s32 536870912, %v299_v29 }
  0xb3   :  { %v385_v45 = vsel %vm377_vm12, %v368_v20, %v384_v39  ;;  %v388_v46 = vsel %vm378_vm11, %v374_v32, 1326507024  ;;  %v382_v47 = vsel %vm376_vm9, %v379_v33, %v381_v36  ;;  %v457_v51 = vadd.s32 1, %v1164_v26 }
  0xb4   :  { %v386_v49 = vsel %vm376_vm9, %v383_v37, %v385_v45  ;;  %v389_v50 = vsel %vm377_vm12, %v371_v25, %v388_v46  ;;  %v301_v52 = vshrl.u32 %v300_v44, 30  ;;  %v1506_v1 = vsub.s32 32, %v1487_v43 }
  0xb5   :  { %v390_v53 = vsel %vm376_vm9, %v387_v40, %v389_v50  ;;  %v1496_v55 = vmul.u32.u64.low %v1442_v17, %v386_v49  ;;  %v1497_v60 = vmul.u32.u64.high %v1442_v17, %v386_v49, %v1496_v55  ;;  %vm458_vm14 = vcmp.gt.s32.totalorder %v457_v51, 0 }
  0xb6   :  { %v1502_v61 = vmul.u32.u64.low %v1442_v17, %v390_v53  ;;  %v1503_v63 = vmul.u32.u64.high %v1442_v17, %v390_v53, %v1502_v61  ;;  %v302_v3 = vshll.u32 %v301_v52, 30  ;;  %v454_v48 = vand.u32 8388607, %v447_v7 }
  0xb7   :  { %v459_v4 = vsel %vm458_vm14, %v457_v51, 0  ;;  %v398_v5 = vmul.u32 %v1442_v17, %v382_v47  ;;  %v1514_v9 = vadd.f32 %v1418_v54, %v1389_v27  ;;  %v1517_v10 = vshrl.u32 %v1450_v41, 5 }
  0xb8   :  { %v461_v6 = vand.u32 31, %v459_v4  ;;  %v1520_v13 = vsel %vm1002_vm13, %v1439_v15, 0  ;;  %v1522_v14 = vsub.s32 %v299_v29, %v302_v3  ;;  %v401_v16 = vadd.s32 1, %v1497_v60 }
  0xb9   :  { %v1527_v18 = vshll.u32 %v1314_v12, %v1487_v43  ;;  %v1531_v17 = vshll.u32 %v1315_v21, %v1487_v43  ;;  %vm400_vm1 = vc.u32 %v1503_v63, %v1496_v55  ;;  %v1537_v54 = vshrl.u32 %v1315_v21, %v1506_v1 }
  0xba   :  { %v462_v27 = vsub.s32 32, %v461_v6  ;;  %v305_v15 = vsub.s32 0, %v1522_v14  ;;  %v402_v41 = vsel %vm400_vm1, %v401_v16, %v1497_v60  ;;  %v455_v19 = vor.u32 8388608, %v454_v48 }
  0xbb   :  { %v1543_v20 = vshrl.u32 %v1316_v24, %v1506_v1  ;;  %v295_v22 = vadd.s32 %v1461_v58, %v1458_v59  ;;  %v325_v23 = vsub.s32 4, %v301_v52  ;;  %v403_v25 = vadd.s32 %v402_v41, %v398_v5 }
  0xbc   :  { %v1157_v26 = vmin.u32 %v305_v15, %v1522_v14  ;;  %v464_v29 = vshll.u32 %v1311_v62, %v461_v6  ;;  %v465_v32 = vshrl.u32 %v1312_v0, %v462_v27  ;;  %v467_v33 = vshll.u32 %v1312_v0, %v461_v6 }
  0xbd   :  { %v404_v35 = vadd.s32 536870912, %v403_v25  ;;  %v468_v36 = vshrl.u32 %v1313_v2, %v462_v27  ;;  %v470_v37 = vshll.u32 %v1313_v2, %v461_v6  ;;  %v471_v39 = vshrl.u32 %v1314_v12, %v462_v27 }
  0xbe   :  { %v307_v40 = vclz %v1157_v26  ;;  %v460_v44 = vshrl.u32 %v459_v4, 5  ;;  %v473_v59 = vshll.u32 %v1314_v12, %v461_v6  ;;  %v1555_v58 = vshll.u32 %v455_v19, 8 }
  0xbf   :  { %v326_v46 = vsel %vm241_vm15, %v325_v23, %v301_v52  ;;  %v405_v47 = vshrl.u32 %v404_v35, 30  ;;  %v474_v49 = vshrl.u32 %v1315_v21, %v462_v27  ;;  %v551_v50 = vand.u32 2147483647, %v1424_v57 }
  0xc0   :  { %v1158_v51 = vadd.s32 4294967294, %v307_v40  ;;  %v463_v53 = vshrl.u32 %v1311_v62, %v462_v27  ;;  %v466_v60 = vor.u32 %v465_v32, %v464_v29  ;;  %v554_v61 = vand.u32 2139095040, %v1424_v57 }
  0xc1   :  { %v406_v38 = vshll.u32 %v405_v47, 30  ;;  %v469_v3 = vor.u32 %v468_v36, %v467_v33  ;;  %v472_v48 = vor.u32 %v471_v39, %v470_v37  ;;  %v476_v4 = vshll.u32 %v1315_v21, %v461_v6 }
  0xc2   :  { %vm1159_vm4 = vcmp.lt.s32.totalorder %v1158_v51, 0  ;;  %v475_v52 = vor.u32 %v474_v49, %v473_v59  ;;  %v477_v5 = vshrl.u32 %v1316_v24, %v462_v27  ;;  %vm479_vm5 = vcmp.lt.s32.totalorder %v460_v44, 1 }
  0xc3   :  { %v310_v16 = vsel %vm1159_vm4, 0, %v1158_v51  ;;  %v1572_v15 = vsub.s32 %v403_v25, %v406_v38  ;;  %v429_v41 = vsub.s32 4, %v405_v47  ;;  %vm482_vm6 = vcmp.lt.s32.totalorder %v460_v44, 4 }
  0xc4   :  { %v311_v19 = vsub.s32 32, %v310_v16  ;;  %v312_v23 = vshll.u32 %v1522_v14, %v310_v16  ;;  %v315_v26 = vsub.s32 4294967266, %v310_v16  ;;  %vm1577_vm7 = vcmp.le.f32.partialorder %v343_v42, 0.7853982 }
  0xc5   :  { %vm481_vm8 = vcmp.lt.s32.totalorder %v460_v44, 3  ;;  %v409_v6 = vsub.s32 0, %v1572_v15  ;;  %vm480_vm9 = vcmp.lt.s32.totalorder %v460_v44, 2  ;;  %v484_v27 = vsel %vm482_vm6, %v472_v48, 2102212464 }
  0xc6   :  { %v487_v25 = vsel %vm479_vm5, %v466_v60, %v469_v3  ;;  %v313_v32 = vshrl.u32 %v295_v22, %v311_v19  ;;  %v316_v33 = vadd.s32 127, %v315_v26  ;;  %v478_v35 = vor.u32 %v477_v5, %v476_v4 }
  0xc7   :  { %v488_v14 = vsel %vm482_vm6, %v475_v52, 920167782  ;;  %v1161_v36 = vmin.u32 %v409_v6, %v1572_v15  ;;  %v483_v42 = vsel %vm479_vm5, %v463_v53, %v466_v60  ;;  %v485_v37 = vsel %vm481_vm8, %v469_v3, %v484_v27 }
  0xc8   :  { %v489_v39 = vsel %vm481_vm8, %v472_v48, %v488_v14  ;;  %v314_v40 = vor.u32 %v313_v32, %v312_v23  ;;  %v317_v59 = vshll.u32 %v316_v33, 23  ;;  %v328_v49 = vsel %vm1559_vm2, 0, %v326_v46 }
  0xc9   :  { %v490_v51 = vsel %vm480_vm9, %v487_v25, %v489_v39  ;;  %v399_v22 = vadd.s32 %v1496_v55, %v1503_v63  ;;  %v411_v38 = vclz %v1161_v36  ;;  %v430_v4 = vsel %vm345_vm3, %v429_v41, %v405_v47 }
  0xca   :  { %v491_v53 = vsel %vm479_vm5, %v469_v3, %v472_v48  ;;  %v318_v60 = vor.u32 4788187, %v317_v59  ;;  %v321_v5 = vcvt.s32.f32 %v314_v40  ;;  %v486_v16 = vsel %vm480_vm9, %v483_v42, %v485_v37 }
  0xcb   :  { %v492_v19 = vsel %vm482_vm6, %v478_v35, 1326507024  ;;  %vm714_vm10 = vcmp.lt.s32.totalorder %v1517_v10, 4  ;;  %v1162_v46 = vadd.s32 4294967294, %v411_v38  ;;  %v332_v6 = vadd.s32 3, %v328_v49 }
  0xcc   :  { %v493_v23 = vsel %vm481_vm8, %v475_v52, %v492_v19  ;;  %v1602_v26 = vmul.u32.u64.low %v1555_v58, %v490_v51  ;;  %v1603_v55 = vmul.u32.u64.high %v1555_v58, %v490_v51, %v1602_v26  ;;  %v319_v63 = vand.u32 2147483647, %v318_v60 }
  0xcd   :  { %v494_v47 = vsel %vm480_vm9, %v491_v53, %v493_v23  ;;  %v555_v3 = vshrl.u32 %v554_v61, 23  ;;  %vm1163_vm11 = vcmp.lt.s32.totalorder %v1162_v46, 0  ;;  %v432_v48 = vsel %vm1577_vm7, 0, %v430_v4 }
  0xce   :  { %v1609_v41 = vmul.u32.u64.low %v1555_v58, %v494_v47  ;;  %v1610_v27 = vmul.u32.u64.high %v1555_v58, %v494_v47, %v1609_v41  ;;  %v322_v25 = vmul.f32 %v321_v5, %v319_v63  ;;  %v414_v32 = vsel %vm1163_vm11, 0, %v1162_v46 }
  0xcf   :  { %v502_v52 = vmul.u32 %v1555_v58, %v486_v16  ;;  %v1168_v33 = vadd.s32 4294967169, %v555_v3  ;;  %v415_v35 = vsub.s32 32, %v414_v32  ;;  %v416_v14 = vshll.u32 %v1572_v15, %v414_v32 }
  0xd0   :  { %v419_v36 = vsub.s32 4294967266, %v414_v32  ;;  %v505_v44 = vadd.s32 1, %v1603_v55  ;;  %v710_v61 = vor.u32 %v1543_v20, %v1531_v17  ;;  %v323_v42 = vxor.u32 2147483648, %v322_v25 }
  0xd1   :  { %v558_v37 = vand.u32 8388607, %v551_v50  ;;  %v561_v39 = vadd.s32 1, %v1168_v33  ;;  %v1619_v40 = vand.u32 3, %v332_v6  ;;  %v417_v59 = vshrl.u32 %v399_v22, %v415_v35 }
  0xd2   :  { %v420_v49 = vadd.s32 127, %v419_v36  ;;  %vm504_vm12 = vc.u32 %v1610_v27, %v1602_v26  ;;  %v324_v58 = vsel %vm241_vm15, %v323_v42, %v322_v25  ;;  %v436_v15 = vadd.s32 3, %v432_v48 }
  0xd3   :  { %v506_v51 = vsel %vm504_vm12, %v505_v44, %v1603_v55  ;;  %vm562_vm13 = vcmp.gt.s32.totalorder %v561_v39, 0  ;;  %v327_v17 = vsel %vm1559_vm2, %v1396_v30, %v324_v58  ;;  %v418_v20 = vor.u32 %v417_v59, %v416_v14 }
  0xd4   :  { %v421_v38 = vshll.u32 %v420_v49, 23  ;;  %v507_v4 = vadd.s32 %v506_v51, %v502_v52  ;;  %1275 = vcosq.f32 %v327_v17  ;;  %v559_v53 = vor.u32 8388608, %v558_v37 }
  0xd5   :  { %v563_v22 = vsel %vm562_vm13, %v561_v39, 0  ;;  %v679_v60 = vand.u32 2147483647, %v1392_v28  ;;  %1277 = vsinq.f32 %v327_v17  ;;  %v425_v16 = vcvt.s32.f32 %v418_v20 }
  0xd6   :  { %v422_v5 = vor.u32 4788187, %v421_v38  ;;  %v508_v19 = vadd.s32 536870912, %v507_v4  ;;  %v1631_v46 = vor.u32 %v1537_v54, %v1527_v18  ;;  %v1635_v45 = vsel %vm714_vm10, %v710_v61, 1326507024 }
  0xd7   :  { %v1638_v23 = vand.u32 31, %v1520_v13  ;;  %v1640_v55 = vand.u32 31, %v563_v22  ;;  %vm335_vm14 = vcmp.eq.s32.totalorder %v1619_v40, 0  ;;  %vm338_vm15 = vcmp.eq.s32.totalorder %v1619_v40, 2 }
  0xd8   :  { %v423_v63 = vand.u32 2147483647, %v422_v5  ;;  %vm449_vm1 = vcmp.lt.s32.totalorder %v1421_v56, 0  ;;  %v509_v6 = vshrl.u32 %v508_v19, 30  ;;  %vm334_vm2 = vcmp.lt.s32.totalorder %v1619_v40, 2 }
  0xd9   :  { %v1646_v18 = vand.u32 3, %v436_v15  ;;  %v1649_v54 = vadd.s32 %v1602_v26, %v1610_v27  ;;  %v566_v47 = vsub.s32 32, %v1640_v55  ;;  %v1652_v3 = vshll.u32 %v559_v53, 8 }
  0xda   :  { %vm331_vm4 = vweird.f32 %v1396_v30  ;;  %v426_v48 = vmul.f32 %v425_v16, %v423_v63  ;;  %v510_v41 = vshll.u32 %v509_v6, 30  ;;  %v1655_v25 = vshrl.u32 %v563_v22, 5 }
  0xdb   :  { %v1659_v32 = vand.u32 8388607, %v679_v60  ;;  %v568_v33 = vshll.u32 %v1311_v62, %v1640_v55  ;;  %v571_v26 = vshll.u32 %v1312_v0, %v1640_v55  ;;  %v1667_v27 = vshrl.u32 %v1311_v62, %v1506_v1 }
  0xdc   :  { %v1671_v35 = vshll.u32 %v1311_v62, %v1487_v43  ;;  %v427_v44 = vxor.u32 2147483648, %v426_v48  ;;  %v1674_v61 = vsub.s32 %v507_v4, %v510_v41  ;;  %v574_v42 = vshll.u32 %v1313_v2, %v1640_v55 }
  0xdd   :  { %v533_v39 = vsub.s32 4, %v509_v6  ;;  %v567_v59 = vshrl.u32 %v1311_v62, %v566_v47  ;;  %v569_v49 = vshrl.u32 %v1312_v0, %v566_v47  ;;  %v577_v58 = vshll.u32 %v1314_v12, %v1640_v55 }
  0xde   :  { %v428_v17 = vsel %vm345_vm3, %v427_v44, %v426_v48  ;;  %v513_v20 = vsub.s32 0, %v1674_v61  ;;  %v572_v38 = vshrl.u32 %v1313_v2, %v566_v47  ;;  %v1276_v4 = vpop.eup %1275  ;;  %v575_v16 = vshrl.u32 %v1314_v12, %v566_v47 }
  0xdf   :  { %v431_v5 = vsel %vm1577_vm7, %v1399_v31, %v428_v17  ;;  %v1278_v19 = vpop.eup %1277  ;;  %v339_v41 = vxor.u32 2147483648, %v1276_v4  ;;  %vm442_vm3 = vcmp.eq.s32.totalorder %v1646_v18, 2  ;;  %vm439_vm5 = vcmp.eq.s32.totalorder %v1646_v18, 0 }
  0xe0   :  { %1279 = vcosq.f32 %v431_v5  ;;  %v1165_v48 = vmin.u32 %v513_v20, %v1674_v61  ;;  %vm438_vm6 = vcmp.lt.s32.totalorder %v1646_v18, 2  ;;  %vm152_vm7 = vcmask 523264  }
  0xe1   :  { %v1207_v52 = vpop.f32.mrb[0].mxu0  ;;  %1281 = vsinq.f32 %v431_v5  ;;  %v340_v29 = vsel %vm338_vm15, %v339_v41, %v1278_v19  ;;  %vm435_vm8 = vweird.f32 %v1399_v31  ;;  %vm583_vm9 = vcmp.lt.s32.totalorder %v1655_v25, 1 }
  0xe2   :  { %v105_v14 = vadd.f32 %v1207_v52, %v1369_v11  ;;  %v96_v36 = vpop.f32.mrb[1].mxu0  ;;  %v336_v52 = vxor.u32 2147483648, %v1278_v19  ;;  %vm584_vm11 = vcmp.lt.s32.totalorder %v1655_v25, 2  ;;  %vm585_vm13 = vcmp.lt.s32.totalorder %v1655_v25, 3 }
  0xe3   :  { %v1208_v37 = vpop.f32.mrb[2].mxu0  ;;  %v1688_v22 = vadd.f32 %v1369_v11, %v96_v36  ;;  %v570_v36 = vor.u32 %v569_v49, %v568_v33  ;;  %v578_v49 = vshrl.u32 %v1315_v21, %v566_v47  ;;  %vm1739_vm15 = vcmp.le.f32.partialorder %v447_v7, 0.7853982 }
  0xe4   :  { %v108_v15 = vadd.f32 %v1208_v37, %v1369_v11  ;;  %v99_v51 = vpop.f32.mrb[3].mxu0  ;;  %v113_v53 = vmax.f32 %v105_v14, 0.0  ;;  %v1697_v14 = vsel %vm449_vm1, %v533_v39, %v509_v6  ;;  %v515_v37 = vclz %v1165_v48 }
  0xe5   :  { %v111_v17 = vmax.f32 %v1688_v22, 0.0  ;;  %v100_v20 = vadd.f32 %v1369_v11, %v99_v51  ;;  %v337_v5 = vsel %vm335_vm14, %v1276_v4, %v336_v52  ;;  %v576_v6 = vor.u32 %v575_v16, %v574_v42 }
  0xe6   :  { %v114_v63 = vmax.f32 %v108_v15, 0.0  ;;  %v573_v15 = vor.u32 %v572_v38, %v571_v26  ;;  %v341_v33 = vsel %vm334_vm2, %v337_v5, %v340_v29  ;;  %v1166_v39 = vadd.s32 4294967294, %v515_v37 }
  0xe7   :  { %v580_v26 = vshll.u32 %v1315_v21, %v1640_v55  ;;  %v342_v11 = vsel %vm331_vm4, nan, %v341_v33  ;;  %v581_v51 = vshrl.u32 %v1316_v24, %v566_v47  ;;  %v579_v40 = vor.u32 %v578_v49, %v577_v58 }
  0xe8   :  { %v1699_v44 = vpack.c.bf16 %v114_v63, %v113_v53  ;;  %1099 = vrot.lane.b32.xlu1 %v342_v11, %s1310_s8  ;;  %vm1167_vm12 = vcmp.lt.s32.totalorder %v1166_v39, 0  ;;  %vm586_vm14 = vcmp.lt.s32.totalorder %v1655_v25, 4  ;;  %v587_v30 = vsel %vm583_vm9, %v567_v59, %v570_v36 }
  0xe9   :  { %v518_v55 = vsel %vm1167_vm12, 0, %v1166_v39  ;;  %v582_v42 = vor.u32 %v581_v51, %v580_v26  ;;  %v588_v47 = vsel %vm586_vm14, %v576_v6, 2102212464  ;;  %v112_v58 = vmax.f32 %v100_v20, 0.0 }
  0xea   :  { %v519_v38 = vsub.s32 32, %v518_v55  ;;  %v520_v4 = vshll.u32 %v1674_v61, %v518_v55  ;;  %v523_v53 = vsub.s32 4294967266, %v518_v55  ;;  %v589_v22 = vsel %vm585_vm13, %v573_v15, %v588_v47  ;;  %v1280_v63 = vpop.eup %1279 }
  0xeb   :  { %v591_v16 = vsel %vm583_vm9, %v570_v36, %v573_v15  ;;  %v592_v19 = vsel %vm586_vm14, %v579_v40, 920167782  ;;  %v595_v59 = vsel %vm583_vm9, %v573_v15, %v576_v6  ;;  %v596_v36 = vsel %vm586_vm14, %v582_v42, 1326507024  ;;  %v1282_v29 = vpop.eup %1281 }
  0xec   :  { %v521_v61 = vshrl.u32 %v1649_v54, %v519_v38  ;;  %v524_v48 = vadd.s32 127, %v523_v53  ;;  %v593_v52 = vsel %vm585_vm13, %v576_v6, %v592_v19  ;;  %v443_v37 = vxor.u32 2147483648, %v1280_v63 }
  0xed   :  { %v590_v15 = vsel %vm584_vm11, %v587_v30, %v589_v22  ;;  %v594_v7 = vsel %vm584_vm11, %v591_v16, %v593_v52  ;;  %v597_v20 = vsel %vm585_vm13, %v579_v40, %v596_v36  ;;  %v440_v5 = vxor.u32 2147483648, %v1282_v29 }
  0xee   :  { %v522_v54 = vor.u32 %v521_v61, %v520_v4  ;;  %v525_v33 = vshll.u32 %v524_v48, 23  ;;  %v598_v6 = vsel %vm584_vm11, %v595_v59, %v597_v20  ;;  %v444_v39 = vsel %vm442_vm3, %v443_v37, %v1282_v29 }
  0xef   :  { %v1759_v49 = vmul.u32.u64.low %v1652_v3, %v598_v6  ;;  %v1760_v26 = vmul.u32.u64.high %v1652_v3, %v598_v6, %v1759_v49  ;;  %v115_v11 = vpack.c.bf16 %v112_v58, %v111_v17  ;;  %v441_v51 = vsel %vm439_vm5, %v1280_v63, %v440_v5 }
  0xf0   :  { %v526_v55 = vor.u32 4788187, %v525_v33  ;;  %v529_v42 = vcvt.s32.f32 %v522_v54  ;;  %v606_v40 = vmul.u32 %v1652_v3, %v590_v15  ;;  %v445_v30 = vsel %vm438_vm6, %v441_v51, %v444_v39 }
  0xf1   :  { %v1768_v25 = vmul.u32.u64.low %v1652_v3, %v594_v7  ;;  %v1769_v47 = vmul.u32.u64.high %v1652_v3, %v594_v7, %v1768_v25  ;;  %1217 = vmatprep.mubr.msk.bf16.mxu1 %vm152_vm7, %v115_v11  ;;  %v697_v17 = vshrl.u32 %v1312_v0, %v1506_v1  ;;  %v446_v38 = vsel %vm435_vm8, nan, %v445_v30 }
  0xf2   :  { %v527_v4 = vand.u32 2147483647, %v526_v55  ;;  %1218 = vmatmul.mubr.msk.bf16.vlgmr.msra.gmra.mrb[0].mxu1 %vm152_vm7, %v1699_v44  ;;  %v699_v18 = vshll.u32 %v1312_v0, %v1487_v43  ;;  %v700_v3 = vshrl.u32 %v1313_v2, %v1506_v1  ;;  %1101 = vrot.lane.b32.xlu0 %v446_v38, %s1310_s8  ;;  %v687_v53 = vor.u32 8388608, %v1659_v32 }
  0xf3   :  { %vm608_vm2 = vc.u32 %v1760_v26, %v1768_v25  ;;  %v698_v31 = vor.u32 %v697_v17, %v1671_v35  ;;  %v702_v22 = vshll.u32 %v1313_v2, %v1487_v43  ;;  %v703_v16 = vshrl.u32 %v1314_v12, %v1506_v1 }
  0xf4   :  { %v530_v58 = vmul.f32 %v529_v42, %v527_v4  ;;  %v701_v44 = vor.u32 %v700_v3, %v699_v18  ;;  %vm711_vm4 = vcmp.lt.s32.totalorder %v1517_v10, 1  ;;  %v720_v19 = vsel %vm714_vm10, %v1631_v46, 920167782 }
  0xf5   :  { %v536_v32 = vsel %vm1739_vm15, 0, %v1697_v14  ;;  %v609_v35 = vadd.s32 1, %v1769_v47  ;;  %vm713_vm3 = vcmp.lt.s32.totalorder %v1517_v10, 3  ;;  %v704_v59 = vor.u32 %v703_v16, %v702_v22 }
  0xf6   :  { %v531_v43 = vxor.u32 2147483648, %v530_v58  ;;  %vm712_vm5 = vcmp.lt.s32.totalorder %v1517_v10, 2  ;;  %v719_v1 = vsel %vm711_vm4, %v698_v31, %v701_v44  ;;  %v715_v14 = vsel %vm711_vm4, %v1667_v27, %v698_v31 }
  0xf7   :  { %v610_v63 = vsel %vm608_vm2, %v609_v35, %v1769_v47  ;;  %v725_v61 = vsel %vm713_vm3, %v1631_v46, %v1635_v45  ;;  %v727_v48 = vshll.u32 %v687_v53, 8  ;;  %v716_v29 = vsel %vm714_vm10, %v704_v59, 2102212464 }
  0xf8   :  { %v532_v52 = vsel %vm449_vm1, %v531_v43, %v530_v58  ;;  %v611_v36 = vadd.s32 %v610_v63, %v606_v40  ;;  %v721_v37 = vsel %vm713_vm3, %v704_v59, %v720_v19  ;;  %v717_v7 = vsel %vm713_vm3, %v701_v44, %v716_v29 }
  0xf9   :  { %v535_v15 = vsel %vm1739_vm15, %v1421_v56, %v532_v52  ;;  %v722_v27 = vsel %vm712_vm5, %v719_v1, %v721_v37  ;;  %v723_v46 = vsel %vm711_vm4, %v701_v44, %v704_v59  ;;  %v540_v45 = vadd.s32 3, %v536_v32 }
  0xfa   :  { %1283 = vcosq.f32 %v535_v15  ;;  %v612_v20 = vadd.s32 536870912, %v611_v36  ;;  %v726_v5 = vsel %vm712_vm5, %v723_v46, %v725_v61  ;;  %v1827_v54 = vsub.s32 32, %v1638_v23 }
  0xfb   :  { %1285 = vsinq.f32 %v535_v15  ;;  %v1829_v33 = vmul.u32.u64.low %v727_v48, %v726_v5  ;;  %v1830_v41 = vmul.u32.u64.high %v727_v48, %v726_v5, %v1829_v33  ;;  %v718_v39 = vsel %vm712_vm5, %v715_v14, %v717_v7 }
  0xfc   :  { %v613_v6 = vshrl.u32 %v612_v20, 30  ;;  %v1834_v49 = vmul.u32.u64.low %v727_v48, %v722_v27  ;;  %v1835_v11 = vmul.u32.u64.high %v727_v48, %v722_v27, %v1834_v49  ;;  %v1838_v51 = vshrl.u32 %v1520_v13, 5 }
  0xfd   :  { %v1842_v55 = vshll.u32 %v1314_v12, %v1638_v23  ;;  %v783_v42 = vand.u32 2147483647, %v1432_v8  ;;  %v786_v40 = vand.u32 2139095040, %v1432_v8  ;;  %v1848_v30 = vshll.u32 %v1315_v21, %v1638_v23 }
  0xfe   :  { %v541_v10 = vand.u32 3, %v540_v45  ;;  %v614_v47 = vshll.u32 %v613_v6, 30  ;;  %v637_v17 = vsub.s32 4, %v613_v6  ;;  %vm553_vm10 = vcmp.lt.s32.totalorder %v1424_v57, 0 }
  0xff   :  { %v734_v38 = vmul.u32 %v727_v48, %v718_v39  ;;  %vm736_vm1 = vc.u32 %v1830_v41, %v1834_v49  ;;  %v787_v13 = vshrl.u32 %v786_v40, 23  ;;  %v1854_v4 = vshrl.u32 %v1315_v21, %v1827_v54 }
 0x100   :  { %v1856_v18 = vsub.s32 %v611_v36, %v614_v47  ;;  %v638_v3 = vsel %vm553_vm10, %v637_v17, %v613_v6  ;;  %v737_v53 = vadd.s32 1, %v1835_v11  ;;  %v1863_v31 = vshrl.u32 %v1316_v24, %v1827_v54 }
 0x101   :  { %vm539_vm6 = vweird.f32 %v1421_v56  ;;  %v1176_v22 = vadd.s32 4294967169, %v787_v13  ;;  %v790_v58 = vand.u32 8388607, %v783_v42  ;;  %vm542_vm8 = vcmp.lt.s32.totalorder %v541_v10, 2 }
 0x102   :  { %vm1870_vm9 = vcmp.le.f32.partialorder %v551_v50, 0.7853982  ;;  %v617_v16 = vsub.s32 0, %v1856_v18  ;;  %v738_v19 = vsel %vm736_vm1, %v737_v53, %v1835_v11  ;;  %v890_v59 = vand.u32 2139095040, %v1514_v9 }
 0x103   :  { %v640_v32 = vsel %vm1870_vm9, 0, %v638_v3  ;;  %v739_v35 = vadd.s32 %v738_v19, %v734_v38  ;;  %v793_v43 = vadd.s32 1, %v1176_v22  ;;  %vm543_vm11 = vcmp.eq.s32.totalorder %v541_v10, 0 }
 0x104   :  { %v1284_v1 = vpop.eup %1283  ;;  %vm546_vm12 = vcmp.eq.s32.totalorder %v541_v10, 2  ;;  %v607_v50 = vadd.s32 %v1768_v25, %v1760_v26  ;;  %v1169_v63 = vmin.u32 %v617_v16, %v1856_v18  ;;  %vm681_vm13 = vcmp.lt.s32.totalorder %v1392_v28, 0 }
 0x105   :  { %v1286_v14 = vpop.eup %1285  ;;  %v547_v61 = vxor.u32 2147483648, %v1284_v1  ;;  %v740_v48 = vadd.s32 536870912, %v739_v35  ;;  %v791_v52 = vor.u32 8388608, %v790_v58  ;;  %vm794_vm14 = vcmp.gt.s32.totalorder %v793_v43, 0 }
 0x106   :  { %v544_v36 = vxor.u32 2147483648, %v1286_v14  ;;  %v619_v29 = vclz %v1169_v63  ;;  %v644_v37 = vadd.s32 3, %v640_v32  ;;  %v887_v15 = vand.u32 2147483647, %v1514_v9 }
 0x107   :  { %v548_v7 = vsel %vm546_vm12, %v547_v61, %v1286_v14  ;;  %vm1886_vm15 = vcmp.le.f32.partialorder %v679_v60, 0.7853982  ;;  %v741_v26 = vshrl.u32 %v740_v48, 30  ;;  %v795_v25 = vsel %vm794_vm14, %v793_v43, 0 }
 0x108   :  { %v891_v46 = vshrl.u32 %v890_v59, 23  ;;  %v545_v45 = vsel %vm543_vm11, %v1284_v1, %v544_v36  ;;  %v1170_v20 = vadd.s32 4294967294, %v619_v29  ;;  %v1892_v5 = vadd.s32 %v1834_v49, %v1830_v41 }
 0x109   :  { %v797_v33 = vand.u32 31, %v795_v25  ;;  %v549_v6 = vsel %vm542_vm8, %v545_v45, %v548_v7  ;;  %v742_v39 = vshll.u32 %v741_v26, 30  ;;  %v765_v11 = vsub.s32 4, %v741_v26 }
 0x10a   :  { %v1895_v40 = vshll.u32 %v791_v52, 8  ;;  %v550_v60 = vsel %vm539_vm6, nan, %v549_v6  ;;  %vm1171_vm2 = vcmp.lt.s32.totalorder %v1170_v20, 0  ;;  %v1901_v17 = vand.u32 8388607, %v887_v15 }
 0x10b   :  { %v798_v47 = vsub.s32 32, %v797_v33  ;;  %1103 = vrot.lane.b32.xlu1 %v550_v60, %s1310_s8  ;;  %v622_v41 = vsel %vm1171_vm2, 0, %v1170_v20  ;;  %v1904_v49 = vand.u32 3, %v644_v37  ;;  %v1906_v10 = vsub.s32 %v739_v35, %v742_v39 }
 0x10c   :  { %v1180_v38 = vadd.s32 4294967169, %v891_v46  ;;  %v623_v13 = vsub.s32 32, %v622_v41  ;;  %v624_v3 = vshll.u32 %v1856_v18, %v622_v41  ;;  %v627_v53 = vsub.s32 4294967266, %v622_v41 }
 0x10d   :  { %v800_v56 = vshll.u32 %v1311_v62, %v797_v33  ;;  %v745_v22 = vsub.s32 0, %v1906_v10  ;;  %v766_v58 = vsel %vm681_vm13, %v765_v11, %v741_v26  ;;  %v801_v16 = vshrl.u32 %v1312_v0, %v798_v47 }
 0x10e   :  { %v803_v19 = vshll.u32 %v1312_v0, %v797_v33  ;;  %v625_v32 = vshrl.u32 %v607_v50, %v623_v13  ;;  %v628_v43 = vadd.s32 127, %v627_v53  ;;  %v804_v35 = vshrl.u32 %v1313_v2, %v798_v47 }
 0x10f   :  { %v806_v59 = vshll.u32 %v1313_v2, %v797_v33  ;;  %v1173_v18 = vmin.u32 %v745_v22, %v1906_v10  ;;  %v796_v1 = vshrl.u32 %v795_v25, 5  ;;  %v807_v63 = vshrl.u32 %v1314_v12, %v798_v47 }
 0x110   :  { %v897_v14 = vadd.s32 1, %v1180_v38  ;;  %v626_v61 = vor.u32 %v625_v32, %v624_v3  ;;  %v629_v48 = vshll.u32 %v628_v43, 23  ;;  %v768_v52 = vsel %vm1886_vm15, 0, %v766_v58 }
 0x111   :  { %v809_v36 = vshll.u32 %v1314_v12, %v797_v33  ;;  %v747_v29 = vclz %v1173_v18  ;;  %v799_v50 = vshrl.u32 %v1311_v62, %v798_v47  ;;  %v802_v37 = vor.u32 %v801_v16, %v800_v56 }
 0x112   :  { %v805_v7 = vor.u32 %v804_v35, %v803_v19  ;;  %v630_v26 = vor.u32 4788187, %v629_v48  ;;  %v633_v46 = vcvt.s32.f32 %v626_v61  ;;  %v808_v45 = vor.u32 %v807_v63, %v806_v59 }
 0x113   :  { %v810_v25 = vshrl.u32 %v1315_v21, %v798_v47  ;;  %v1174_v20 = vadd.s32 4294967294, %v747_v29  ;;  %v812_v6 = vshll.u32 %v1315_v21, %v797_v33  ;;  %v813_v39 = vshrl.u32 %v1316_v24, %v798_v47 }
 0x114   :  { %vm815_vm4 = vcmp.lt.s32.totalorder %v796_v1, 1  ;;  %v631_v11 = vand.u32 2147483647, %v630_v26  ;;  %vm816_vm3 = vcmp.lt.s32.totalorder %v796_v1, 2  ;;  %vm817_vm5 = vcmp.lt.s32.totalorder %v796_v1, 3 }
 0x115   :  { %v811_v60 = vor.u32 %v810_v25, %v809_v36  ;;  %vm1175_vm1 = vcmp.lt.s32.totalorder %v1174_v20, 0  ;;  %v814_v41 = vor.u32 %v813_v39, %v812_v6  ;;  %vm818_vm6 = vcmp.lt.s32.totalorder %v796_v1, 4 }
 0x116   :  { %v819_v38 = vsel %vm815_vm4, %v799_v50, %v802_v37  ;;  %v634_v13 = vmul.f32 %v633_v46, %v631_v11  ;;  %v750_v3 = vsel %vm1175_vm1, 0, %v1174_v20  ;;  %v820_v53 = vsel %vm818_vm6, %v808_v45, 2102212464 }
 0x117   :  { %v823_v56 = vsel %vm815_vm4, %v802_v37, %v805_v7  ;;  %v751_v22 = vsub.s32 32, %v750_v3  ;;  %v752_v33 = vshll.u32 %v1906_v10, %v750_v3  ;;  %v755_v47 = vsub.s32 4294967266, %v750_v3 }
 0x118   :  { %v821_v58 = vsel %vm817_vm5, %v805_v7, %v820_v53  ;;  %v635_v16 = vxor.u32 2147483648, %v634_v13  ;;  %v772_v19 = vadd.s32 3, %v768_v52  ;;  %v824_v32 = vsel %vm818_vm6, %v811_v60, 920167782 }
 0x119   :  { %v827_v43 = vsel %vm815_vm4, %v805_v7, %v808_v45  ;;  %v753_v35 = vshrl.u32 %v1892_v5, %v751_v22  ;;  %v756_v59 = vadd.s32 127, %v755_v47  ;;  %v825_v18 = vsel %vm817_vm5, %v808_v45, %v824_v32 }
 0x11a   :  { %v828_v63 = vsel %vm818_vm6, %v814_v41, 1326507024  ;;  %v636_v61 = vsel %vm553_vm10, %v635_v16, %v634_v13  ;;  %v822_v10 = vsel %vm816_vm3, %v819_v38, %v821_v58  ;;  %v826_v48 = vsel %vm816_vm3, %v823_v56, %v825_v18 }
 0x11b   :  { %v829_v52 = vsel %vm817_vm5, %v811_v60, %v828_v63  ;;  %v639_v36 = vsel %vm1870_vm9, %v1424_v57, %v636_v61  ;;  %v754_v29 = vor.u32 %v753_v35, %v752_v33  ;;  %v757_v5 = vshll.u32 %v756_v59, 23 }
 0x11c   :  { %v830_v50 = vsel %vm816_vm3, %v827_v43, %v829_v52  ;;  %1287 = vcosq.f32 %v639_v36  ;;  %vm898_vm10 = vcmp.gt.s32.totalorder %v897_v14, 0  ;;  %v1951_v25 = vor.u32 %v1854_v4, %v1842_v55 }
 0x11d   :  { %v1946_v37 = vmul.u32.u64.low %v1895_v40, %v830_v50  ;;  %v1947_v7 = vmul.u32.u64.high %v1895_v40, %v830_v50, %v1946_v37  ;;  %1289 = vsinq.f32 %v639_v36  ;;  %v758_v26 = vor.u32 4788187, %v757_v5 }
 0x11e   :  { %v761_v46 = vcvt.s32.f32 %v754_v29  ;;  %v899_v45 = vsel %vm898_vm10, %v897_v14, 0  ;;  %v1954_v44 = vmul.u32.u64.low %v1895_v40, %v826_v48  ;;  %v1955_v20 = vmul.u32.u64.high %v1895_v40, %v826_v48, %v1954_v44 }
 0x11f   :  { %v901_v1 = vand.u32 31, %v899_v45  ;;  %vm647_vm8 = vcmp.eq.s32.totalorder %v1904_v49, 0  ;;  %vm650_vm9 = vcmp.eq.s32.totalorder %v1904_v49, 2  ;;  %v759_v6 = vand.u32 2147483647, %v758_v26 }
 0x120   :  { %v895_v39 = vor.u32 8388608, %v1901_v17  ;;  %vm646_vm11 = vcmp.lt.s32.totalorder %v1904_v49, 2  ;;  %v1962_v14 = vand.u32 3, %v772_v19  ;;  %v838_v55 = vmul.u32 %v1895_v40, %v822_v10 }
 0x121   :  { %vm840_vm12 = vc.u32 %v1947_v7, %v1954_v44  ;;  %v902_v4 = vsub.s32 32, %v901_v1  ;;  %vm643_vm14 = vweird.f32 %v1424_v57  ;;  %v762_v11 = vmul.f32 %v761_v46, %v759_v6 }
 0x122   :  { %v904_v60 = vshll.u32 %v1311_v62, %v901_v1  ;;  %v907_v41 = vshll.u32 %v1312_v0, %v901_v1  ;;  %v910_v38 = vshll.u32 %v1313_v2, %v901_v1  ;;  %v841_v17 = vadd.s32 1, %v1955_v20 }
 0x123   :  { %v905_v13 = vshrl.u32 %v1312_v0, %v902_v4  ;;  %v908_v3 = vshrl.u32 %v1313_v2, %v902_v4  ;;  %v913_v40 = vshll.u32 %v1314_v12, %v901_v1  ;;  %vm1026_vm2 = vcmp.lt.s32.totalorder %v1838_v51, 4 }
 0x124   :  { %v763_v53 = vxor.u32 2147483648, %v762_v11  ;;  %v900_v56 = vshrl.u32 %v899_v45, 5  ;;  %v911_v22 = vshrl.u32 %v1314_v12, %v902_v4  ;;  %v914_v33 = vshrl.u32 %v1315_v21, %v902_v4 }
 0x125   :  { %v842_v47 = vsel %vm840_vm12, %v841_v17, %v1955_v20  ;;  %v916_v58 = vshll.u32 %v1315_v21, %v901_v1  ;;  %v917_v16 = vshrl.u32 %v1316_v24, %v902_v4  ;;  %v1984_v19 = vshll.u32 %v895_v39, 8 }
 0x126   :  { %v764_v32 = vsel %vm681_vm13, %v763_v53, %v762_v11  ;;  %v843_v43 = vadd.s32 %v842_v47, %v838_v55  ;;  %v903_v35 = vshrl.u32 %v1311_v62, %v902_v4  ;;  %v906_v59 = vor.u32 %v905_v13, %v904_v60  ;;  %v1288_v18 = vpop.eup %1287 }
 0x127   :  { %v767_v63 = vsel %vm1886_vm15, %v1392_v28, %v764_v32  ;;  %v909_v61 = vor.u32 %v908_v3, %v907_v41  ;;  %v912_v10 = vor.u32 %v911_v22, %v910_v38  ;;  %v915_v48 = vor.u32 %v914_v33, %v913_v40  ;;  %v1290_v21 = vpop.eup %1289 }
 0x128   :  { %v651_v52 = vxor.u32 2147483648, %v1288_v18  ;;  %1291 = vcosq.f32 %v767_v63  ;;  %v844_v24 = vadd.s32 536870912, %v843_v43  ;;  %vm919_vm4 = vcmp.lt.s32.totalorder %v900_v56, 1 }
 0x129   :  { %v648_v36 = vxor.u32 2147483648, %v1290_v21  ;;  %1293 = vsinq.f32 %v767_v63  ;;  %v918_v29 = vor.u32 %v917_v16, %v916_v58  ;;  %vm922_vm13 = vcmp.lt.s32.totalorder %v900_v56, 4 }
 0x12a   :  { %v652_v5 = vsel %vm650_vm9, %v651_v52, %v1290_v21  ;;  %v1994_v50 = vshrl.u32 %v844_v24, 30  ;;  %vm921_vm3 = vcmp.lt.s32.totalorder %v900_v56, 3  ;;  %v924_v27 = vsel %vm922_vm13, %v912_v10, 2102212464 }
 0x12b   :  { %v649_v37 = vsel %vm647_vm8, %v1288_v18, %v648_v36  ;;  %vm920_vm15 = vcmp.lt.s32.totalorder %v900_v56, 2  ;;  %v927_v26 = vsel %vm919_vm4, %v906_v59, %v909_v61  ;;  %v928_v46 = vsel %vm922_vm13, %v915_v48, 920167782 }
 0x12c   :  { %v653_v45 = vsel %vm646_vm11, %v649_v37, %v652_v5  ;;  %v846_v20 = vshll.u32 %v1994_v50, 30  ;;  %v923_v1 = vsel %vm919_vm4, %v903_v35, %v906_v59  ;;  %v931_v6 = vsel %vm919_vm4, %v909_v61, %v912_v10 }
 0x12d   :  { %v654_v39 = vsel %vm643_vm14, nan, %v653_v45  ;;  %v925_v55 = vsel %vm921_vm3, %v909_v61, %v924_v27  ;;  %v929_v4 = vsel %vm921_vm3, %v912_v10, %v928_v46  ;;  %v932_v11 = vsel %vm922_vm13, %v918_v29, 1326507024 }
 0x12e   :  { %v1022_v60 = vor.u32 %v1863_v31, %v1848_v30  ;;  %1105 = vrot.lane.b32.xlu0 %v654_v39, %s1310_s8  ;;  %v2014_v49 = vsub.s32 %v843_v43, %v846_v20  ;;  %v930_v41 = vsel %vm920_vm15, %v927_v26, %v929_v4  ;;  %v933_v38 = vsel %vm921_vm3, %v915_v48, %v932_v11 }
 0x12f   :  { %v1032_v57 = vsel %vm1026_vm2, %v1951_v25, 920167782  ;;  %v934_v17 = vsel %vm920_vm15, %v931_v6, %v933_v38  ;;  %v2023_v13 = vmul.u32.u64.low %v1984_v19, %v930_v41  ;;  %v2024_v3 = vmul.u32.u64.high %v1984_v19, %v930_v41, %v2023_v13 }
 0x130   :  { %v849_v30 = vsub.s32 0, %v2014_v49  ;;  %v926_v31 = vsel %vm920_vm15, %v923_v1, %v925_v55  ;;  %v2030_v40 = vmul.u32.u64.low %v1984_v19, %v934_v17  ;;  %v2031_v53 = vmul.u32.u64.high %v1984_v19, %v934_v17, %v2030_v40 }
 0x131   :  { %vm771_vm5 = vweird.f32 %v1392_v28  ;;  %vm774_vm1 = vcmp.lt.s32.totalorder %v1962_v14, 2  ;;  %vm775_vm6 = vcmp.eq.s32.totalorder %v1962_v14, 0  ;;  %v991_v22 = vand.u32 2147483647, %v1404_v34 }
 0x132   :  { %v1292_v33 = vpop.eup %1291  ;;  %vm778_vm10 = vcmp.eq.s32.totalorder %v1962_v14, 2  ;;  %v1177_v47 = vmin.u32 %v849_v30, %v2014_v49  ;;  %v1008_v56 = vshll.u32 %v1311_v62, %v1638_v23  ;;  %v1009_v58 = vshrl.u32 %v1312_v0, %v1827_v54 }
 0x133   :  { %v1294_v16 = vpop.eup %1293  ;;  %v779_v32 = vxor.u32 2147483648, %v1292_v33  ;;  %v839_v43 = vadd.s32 %v1954_v44, %v1947_v7  ;;  %v942_v35 = vmul.u32 %v1984_v19, %v926_v31  ;;  %v945_v59 = vadd.s32 1, %v2024_v3 }
 0x134   :  { %v776_v18 = vxor.u32 2147483648, %v1294_v16  ;;  %v851_v63 = vclz %v1177_v47  ;;  %v1011_v61 = vshll.u32 %v1312_v0, %v1638_v23  ;;  %v1012_v10 = vshrl.u32 %v1313_v2, %v1827_v54 }
 0x135   :  { %v780_v48 = vsel %vm778_vm10, %v779_v32, %v1294_v16  ;;  %vm944_vm8 = vc.u32 %v2031_v53, %v2023_v13  ;;  %v998_v21 = vand.u32 8388607, %v991_v22  ;;  %v1007_v7 = vshrl.u32 %v1311_v62, %v1827_v54 }
 0x136   :  { %v777_v44 = vsel %vm775_vm6, %v1292_v33, %v776_v18  ;;  %v1178_v19 = vadd.s32 4294967294, %v851_v63  ;;  %v946_v52 = vsel %vm944_vm8, %v945_v59, %v2024_v3  ;;  %v1010_v0 = vor.u32 %v1009_v58, %v1008_v56 }
 0x137   :  { %v781_v24 = vsel %vm774_vm1, %v777_v44, %v780_v48  ;;  %v947_v36 = vadd.s32 %v946_v52, %v942_v35  ;;  %v1014_v29 = vshll.u32 %v1313_v2, %v1638_v23  ;;  %v1015_v5 = vshrl.u32 %v1314_v12, %v1827_v54 }
 0x138   :  { %v782_v62 = vsel %vm771_vm5, nan, %v781_v24  ;;  %vm1179_vm9 = vcmp.lt.s32.totalorder %v1178_v19, 0  ;;  %v1013_v27 = vor.u32 %v1012_v10, %v1011_v61  ;;  %vm1023_vm11 = vcmp.lt.s32.totalorder %v1838_v51, 1 }
 0x139   :  { %1115 = vrot.lane.b32.xlu1 %v782_v62, %s1317_s2  ;;  %v854_v37 = vsel %vm1179_vm9, 0, %v1178_v19  ;;  %v948_v14 = vadd.s32 536870912, %v947_v36  ;;  %v1016_v26 = vor.u32 %v1015_v5, %v1014_v29  ;;  %vm1025_vm12 = vcmp.lt.s32.totalorder %v1838_v51, 3 }
 0x13a   :  { %v855_v46 = vsub.s32 32, %v854_v37  ;;  %v856_v2 = vshll.u32 %v2014_v49, %v854_v37  ;;  %v859_v23 = vsub.s32 4294967266, %v854_v37  ;;  %v999_v12 = vor.u32 8388608, %v998_v21 }
 0x13b   :  { %v1036_v28 = vsel %vm1026_vm2, %v1022_v60, 1326507024  ;;  %v2074_v54 = vshrl.u32 %v948_v14, 30  ;;  %vm1024_vm14 = vcmp.lt.s32.totalorder %v1838_v51, 2  ;;  %v1028_v45 = vsel %vm1026_vm2, %v1016_v26, 2102212464 }
 0x13c   :  { %v857_v20 = vshrl.u32 %v839_v43, %v855_v46  ;;  %v860_v1 = vadd.s32 127, %v859_v23  ;;  %v1031_v6 = vsel %vm1023_vm11, %v1010_v0, %v1013_v27  ;;  %v1033_v39 = vsel %vm1025_vm12, %v1016_v26, %v1032_v57 }
 0x13d   :  { %v950_v55 = vshll.u32 %v2074_v54, 30  ;;  %v1027_v4 = vsel %vm1023_vm11, %v1007_v7, %v1010_v0  ;;  %v1035_v11 = vsel %vm1023_vm11, %v1013_v27, %v1016_v26  ;;  %v1037_v41 = vsel %vm1025_vm12, %v1951_v25, %v1036_v28 }
 0x13e   :  { %v858_v60 = vor.u32 %v857_v20, %v856_v2  ;;  %v861_v49 = vshll.u32 %v860_v1, 23  ;;  %v1039_v38 = vshll.u32 %v999_v12, 8  ;;  %v1029_v3 = vsel %vm1025_vm12, %v1013_v27, %v1028_v45 }
 0x13f   :  { %v951_v17 = vsub.s32 %v947_v36, %v950_v55  ;;  %v1034_v57 = vsel %vm1024_vm14, %v1031_v6, %v1033_v39  ;;  %v1038_v30 = vsel %vm1024_vm14, %v1035_v11, %v1037_v41  ;;  %v869_v33 = vsub.s32 4, %v1994_v50 }
 0x140   :  { %v862_v31 = vor.u32 4788187, %v861_v49  ;;  %v865_v40 = vcvt.s32.f32 %v858_v60  ;;  %v2098_v56 = vmul.u32.u64.low %v1039_v38, %v1038_v30  ;;  %v2099_v58 = vmul.u32.u64.high %v1039_v38, %v1038_v30, %v2098_v56 }
 0x141   :  { %v953_v47 = vsub.s32 0, %v951_v17  ;;  %v1030_v16 = vsel %vm1024_vm14, %v1027_v4, %v1029_v3  ;;  %v2103_v32 = vmul.u32.u64.low %v1039_v38, %v1034_v57  ;;  %v2104_v43 = vmul.u32.u64.high %v1039_v38, %v1034_v57, %v2103_v32 }
 0x142   :  { %v863_v25 = vand.u32 2147483647, %v862_v31  ;;  %vm785_vm2 = vcmp.lt.s32.totalorder %v1432_v8, 0  ;;  %v1046_v61 = vmul.u32 %v1039_v38, %v1030_v16  ;;  %vm2111_vm4 = vcmp.le.f32.partialorder %v783_v42, 0.7853982 }
 0x143   :  { %v1181_v35 = vmin.u32 %v953_v47, %v951_v17  ;;  %v870_v18 = vsel %vm785_vm2, %v869_v33, %v1994_v50  ;;  %vm1048_vm13 = vc.u32 %v2099_v58, %v2103_v32  ;;  %v1049_v48 = vadd.s32 1, %v2104_v43 }
 0x144   :  { %v866_v59 = vmul.f32 %v865_v40, %v863_v25  ;;  %v872_v44 = vsel %vm2111_vm4, 0, %v870_v18  ;;  %v943_v19 = vadd.s32 %v2023_v13, %v2031_v53  ;;  %v973_v45 = vsub.s32 4, %v2074_v54 }
 0x145   :  { %v955_v63 = vclz %v1181_v35  ;;  %v1050_v50 = vsel %vm1048_vm13, %v1049_v48, %v2104_v43  ;;  %v876_v5 = vadd.s32 3, %v872_v44  ;;  %vm875_vm5 = vweird.f32 %v1432_v8 }
 0x146   :  { %v867_v51 = vxor.u32 2147483648, %v866_v59  ;;  %v1051_v52 = vadd.s32 %v1050_v50, %v1046_v61  ;;  %vm889_vm10 = vcmp.lt.s32.totalorder %v1514_v9, 0  ;;  %vm2134_vm8 = vcmp.le.f32.partialorder %v887_v15, 0.7853982 }
 0x147   :  { %v1182_v21 = vadd.s32 4294967294, %v955_v63  ;;  %v877_v2 = vand.u32 3, %v876_v5  ;;  %v974_v38 = vsel %vm889_vm10, %v973_v45, %v2074_v54  ;;  %v1047_v54 = vadd.s32 %v2103_v32, %v2099_v58 }
 0x148   :  { %v868_v7 = vsel %vm785_vm2, %v867_v51, %v866_v59  ;;  %v1052_v62 = vadd.s32 536870912, %v1051_v52  ;;  %v976_v15 = vsel %vm2134_vm8, 0, %v974_v38  ;;  %vm979_vm2 = vweird.f32 %v1514_v9 }
 0x149   :  { %v871_v42 = vsel %vm2111_vm4, %v1432_v8, %v868_v7  ;;  %vm1183_vm3 = vcmp.lt.s32.totalorder %v1182_v21, 0  ;;  %vm882_vm15 = vcmp.eq.s32.totalorder %v877_v2, 2  ;;  %vm879_vm1 = vcmp.eq.s32.totalorder %v877_v2, 0 }
 0x14a   :  { %1295 = vcosq.f32 %v871_v42  ;;  %v958_v0 = vsel %vm1183_vm3, 0, %v1182_v21  ;;  %v2126_v14 = vshrl.u32 %v1052_v62, 30  ;;  %vm878_vm6 = vcmp.lt.s32.totalorder %v877_v2, 2 }
 0x14b   :  { %1297 = vsinq.f32 %v871_v42  ;;  %v959_v24 = vsub.s32 32, %v958_v0  ;;  %v960_v36 = vshll.u32 %v951_v17, %v958_v0  ;;  %v963_v29 = vsub.s32 4294967266, %v958_v0 }
 0x14c   :  { %v1054_v23 = vshll.u32 %v2126_v14, 30  ;;  %v980_v47 = vadd.s32 3, %v976_v15  ;;  %v1077_v58 = vsub.s32 4, %v2126_v14  ;;  %vm993_vm4 = vcmp.lt.s32.totalorder %v1404_v34, 0 }
 0x14d   :  { %v961_v27 = vshrl.u32 %v943_v19, %v959_v24  ;;  %v964_v37 = vadd.s32 127, %v963_v29  ;;  %vm992_vm13 = vcmp.le.f32.partialorder %v991_v22, 0.7853982 }
 0x14e   :  { %v1055_v12 = vsub.s32 %v1051_v52, %v1054_v23  ;;  %v981_v59 = vand.u32 3, %v980_v47  ;;  %v1078_v0 = vsel %vm993_vm4, %v1077_v58, %v2126_v14 }
 0x14f   :  { %v962_v26 = vor.u32 %v961_v27, %v960_v36  ;;  %v965_v46 = vshll.u32 %v964_v37, 23  ;;  %v1080_v5 = vsel %vm992_vm13, 0, %v1078_v0 }
 0x150   :  { %v1057_v1 = vsub.s32 0, %v1055_v12  ;;  %vm986_vm11 = vcmp.eq.s32.totalorder %v981_v59, 2  ;;  %vm983_vm12 = vcmp.eq.s32.totalorder %v981_v59, 0  ;;  %vm982_vm14 = vcmp.lt.s32.totalorder %v981_v59, 2 }
 0x151   :  { %v966_v13 = vor.u32 4788187, %v965_v46  ;;  %v969_v53 = vcvt.s32.f32 %v962_v26 }
 0x152   :  { %v1185_v11 = vmin.u32 %v1057_v1, %v1055_v12 }
 0x153   :  { %v967_v28 = vand.u32 2147483647, %v966_v13  ;;  %v150_v13 = vpop.permute.xlu0 %149 }
 0x154   :  { %v1296_v20 = vpop.eup %1295  ;;  %v1059_v3 = vclz %v1185_v11 }
 0x155   :  { %v1298_v6 = vpop.eup %1297  ;;  %v883_v39 = vxor.u32 2147483648, %v1296_v20  ;;  %v970_v55 = vmul.f32 %v969_v53, %v967_v28 }
 0x156   :  { %v880_v4 = vxor.u32 2147483648, %v1298_v6  ;;  %v1186_v33 = vadd.s32 4294967294, %v1059_v3 }
 0x157   :  { %v884_v60 = vsel %vm882_vm15, %v883_v39, %v1298_v6  ;;  %v971_v41 = vxor.u32 2147483648, %v970_v55 }
 0x158   :  { %v881_v17 = vsel %vm879_vm1, %v1296_v20, %v880_v4  ;;  %vm1187_vm9 = vcmp.lt.s32.totalorder %v1186_v33, 0  ;;  %vm1083_vm1 = vweird.f32 %v1404_v34 }
 0x159   :  { %v885_v57 = vsel %vm878_vm6, %v881_v17, %v884_v60  ;;  %v972_v30 = vsel %vm889_vm10, %v971_v41, %v970_v55  ;;  %v1062_v56 = vsel %vm1187_vm9, 0, %v1186_v33  ;;  %vm1127_vm6 = vcmask 261120  }
 0x15a   :  { %v886_v31 = vsel %vm875_vm5, nan, %v885_v57  ;;  %v975_v40 = vsel %vm2134_vm8, %v1514_v9, %v972_v30  ;;  %v1063_v8 = vsub.s32 32, %v1062_v56  ;;  %v1064_v25 = vshll.u32 %v1055_v12, %v1062_v56  ;;  %v1100_v53 = vpop.permute.xlu1 %1099 }
 0x15b   :  { %1117 = vrot.lane.b32.xlu0 %v886_v31, %s1317_s2  ;;  %1299 = vcosq.f32 %v975_v40  ;;  %v1067_v16 = vsub.s32 4294967266, %v1062_v56  ;;  %v1084_v9 = vadd.s32 3, %v1080_v5 }
 0x15c   :  { %1301 = vsinq.f32 %v975_v40  ;;  %v1065_v43 = vshrl.u32 %v1047_v54, %v1063_v8 }
 0x15d   :  { %v1068_v35 = vadd.s32 127, %v1067_v16  ;;  %v1085_v62 = vand.u32 3, %v1084_v9 }
 0x15e   :  { %v1066_v18 = vor.u32 %v1065_v43, %v1064_v25 }
 0x15f   :  { %v1069_v63 = vshll.u32 %v1068_v35, 23  ;;  %vm1090_vm3 = vcmp.eq.s32.totalorder %v1085_v62, 2  ;;  %vm1087_vm15 = vcmp.eq.s32.totalorder %v1085_v62, 0  ;;  %vm1086_vm5 = vcmp.lt.s32.totalorder %v1085_v62, 2 }
 0x160   :  { %v1073_v10 = vcvt.s32.f32 %v1066_v18 }
 0x161   :  { %v1070_v61 = vor.u32 4788187, %v1069_v63 }
 0x163   :  { %v1071_v7 = vand.u32 2147483647, %v1070_v61 }
 0x164   :  { %v1102_v12 = vpop.permute.xlu0 %1101 }
 0x165   :  { %v1300_v51 = vpop.eup %1299  ;;  %v1074_v50 = vmul.f32 %v1073_v10, %v1071_v7 }
 0x166   :  { %v1302_v48 = vpop.eup %1301  ;;  %v987_v21 = vxor.u32 2147483648, %v1300_v51 }
 0x167   :  { %v984_v32 = vxor.u32 2147483648, %v1302_v48  ;;  %v1075_v52 = vxor.u32 2147483648, %v1074_v50 }
 0x168   :  { %v988_v44 = vsel %vm986_vm11, %v987_v21, %v1302_v48 }
 0x169   :  { %v985_v42 = vsel %vm983_vm12, %v1300_v51, %v984_v32  ;;  %v1076_v36 = vsel %vm993_vm4, %v1075_v52, %v1074_v50 }
 0x16a   :  { %v989_v19 = vsel %vm982_vm14, %v985_v42, %v988_v44  ;;  %v1079_v29 = vsel %vm992_vm13, %v1404_v34, %v1076_v36 }
 0x16b   :  { %v990_v24 = vsel %vm979_vm2, nan, %v989_v19  ;;  %1303 = vcosq.f32 %v1079_v29 }
 0x16c   :  { %1119 = vrot.lane.b32.xlu1 %v990_v24, %s1317_s2  ;;  %1305 = vsinq.f32 %v1079_v29 }
 0x175   :  { %v1304_v27 = vpop.eup %1303 }
 0x176   :  { %v1306_v37 = vpop.eup %1305  ;;  %v1091_v26 = vxor.u32 2147483648, %v1304_v27 }
 0x177   :  { %v1088_v22 = vxor.u32 2147483648, %v1306_v37 }
 0x178   :  { %v1092_v14 = vsel %vm1090_vm3, %v1091_v26, %v1306_v37 }
 0x179   :  { %v1089_v46 = vsel %vm1087_vm15, %v1304_v27, %v1088_v22 }
 0x17a   :  { %v1093_v2 = vsel %vm1086_vm5, %v1089_v46, %v1092_v14 }
 0x17b   :  { %v1094_v23 = vsel %vm1083_vm1, nan, %v1093_v2 }
 0x17c   :  { %1121 = vrot.lane.b32.xlu0 %v1094_v23, %s1317_s2 }
 0x17d   :  { %v1104_v28 = vpop.permute.xlu1 %1103 }
 0x1a0   :  { %v1106_v39 = vpop.permute.xlu0 %1105 }
 0x1ab   :  { %v1116_v4 = vpop.permute.xlu1 %1115 }
 0x1c5   :  { %v1219_v45 = vpop.f32.mrb[0].mxu1 }
 0x1c6   :  { %v193_v20 = vpop.f32.mrb[1].mxu1  ;;  %v202_v17 = vadd.f32 %v1219_v45, %v150_v13 }
 0x1c7   :  { %v194_v1 = vadd.f32 %v193_v20, %v150_v13  ;;  %v1220_v6 = vpop.f32.mrb[2].mxu1 }
 0x1c8   :  { %v196_v55 = vpop.f32.mrb[3].mxu1  ;;  %v1130_v3 = vsel %vm1127_vm6, %v202_v17, %v1104_v28  ;;  %v205_v31 = vadd.f32 %v1220_v6, %v150_v13 }
 0x1c9   :  { %v1128_v34 = vsel %vm1127_vm6, %v194_v1, %v1100_v53  ;;  %v197_v11 = vadd.f32 %v196_v55, %v150_v13 }
 0x1ca   :  { %v1132_v60 = vsel %vm55_vm0, %v1128_v34, %v1116_v4  ;;  %v1131_v40 = vsel %vm1127_vm6, %v205_v31, %v1106_v39 }
 0x1cb   :  { %1136 = vst.msk [vmem:[%s2187_s4] sm:$0xff] %vm152_vm7, %v1132_v60  ;;  %v1129_v49 = vsel %vm1127_vm6, %v197_v11, %v1102_v12 }
 0x1cd   :  { %v1118_v41 = vpop.permute.xlu0 %1117 }
 0x1ce   :  { %v1133_v38 = vsel %vm55_vm0, %v1129_v49, %v1118_v41 }
 0x1cf   :  { %1137 = vst.msk [vmem:[%s2187_s4 + $0x8] sm:$0xff] %vm152_vm7, %v1133_v38 }
 0x1de   :  { %v1120_v57 = vpop.permute.xlu1 %1119 }
 0x1df   :  { %v1134_v30 = vsel %vm55_vm0, %v1130_v3, %v1120_v57 }
 0x1e0   :  { %1138 = vst.msk [vmem:[%s2187_s4 + $0x10] sm:$0xff] %vm152_vm7, %v1134_v30 }
 0x1ee   :  { %v1122_v15 = vpop.permute.xlu0 %1121 }
 0x1ef   :  { %v1135_v33 = vsel %vm55_vm0, %v1131_v40, %v1122_v15 }
 0x1f0   :  { %1139 = vst.msk [vmem:[%s2187_s4 + $0x18] sm:$0xff] %vm152_vm7, %v1135_v33 }

</bundles_post_ra>
